<compile_context>
chip_gen: v7x
topology: tpu7x:2x2x1
jax: 0.10.0
libtpu: 0.0.40
codegen_flags: <defaults>
</compile_context>

<pallas_src>
import jax
import jax.numpy as jnp
from jax.experimental import pallas as pl

HIDDEN = 200
BN_EPS = 1e-5


def _discriminator_kernel(in_ref, w1_ref, p_ref, out_ref):
    # Packed parameter block: row 0 = b1, row 1 = gamma*w2, row 2 = [bias2,0..]
    b1 = p_ref[0:1, :]          # (1, HIDDEN)
    gw2 = p_ref[1:2, :]         # (1, HIDDEN)  == gamma * fc2.weight
    bias2 = p_ref[2:3, 0:1]     # (1, 1)       == sum(beta * fc2.weight) + b2

    # --- fc1 + ReLU: single MXU pass over the fused [x, c] operand ----------
    h = jnp.dot(in_ref[...], w1_ref[...],
                preferred_element_type=jnp.float32) + b1
    h = jnp.maximum(h, 0.0)

    # --- BatchNorm1d (training mode: batch mean, biased var, eps=1e-5) ------
    mean = jnp.mean(h, axis=0, keepdims=True)           # (1, HIDDEN)
    centered = h - mean                                  # (bs, HIDDEN)
    var = jnp.mean(centered * centered, axis=0, keepdims=True)

    # --- BN affine + fc2 folded into one (1,HIDDEN) scale + lane reduction --
    gw = gw2 * jax.lax.rsqrt(var + BN_EPS)               # (1, HIDDEN)
    logits = jnp.sum(centered * gw, axis=-1, keepdims=True) + bias2  # (bs, 1)

    # --- numerically stable sigmoid -----------------------------------------
    z = jnp.exp(-jnp.abs(logits))
    out_ref[...] = jnp.where(logits >= 0.0, 1.0 / (1.0 + z), z / (1.0 + z))


def discriminator_forward(x, c, params):
    """x: (bs, window_size) f32, c: (bs, num_classes) f32 or None -> (bs, 1)."""
    inputs = x if c is None else jnp.concatenate([x, c], axis=1)
    bs, in_size = inputs.shape

    # Fold parameter-only constants (free under jit with constant params) and
    # pack all row-parameters into a single (3, HIDDEN) block.
    gw2 = params["gamma"] * params["w2"]                               # (1, H)
    bias2 = (jnp.sum(params["beta"] * params["w2"], axis=-1, keepdims=True)
             + params["b2"][0])                                        # (1, 1)
    bias2_row = jnp.concatenate(
        [bias2, jnp.zeros((1, HIDDEN - 1), jnp.float32)], axis=1)      # (1, H)
    packed = jnp.concatenate([params["b1"], gw2, bias2_row], axis=0)   # (3, H)

    full = lambda shape: pl.BlockSpec(shape, lambda: tuple(0 for _ in shape))

    return pl.pallas_call(
        _discriminator_kernel,
        out_shape=jax.ShapeDtypeStruct((bs, 1), jnp.float32),
        grid=(),
        in_specs=[
            full((bs, in_size)),        # fused [x, c] inputs
            full((in_size, HIDDEN)),    # fc1 weight (transposed vs torch)
            full((3, HIDDEN)),          # packed [b1; gamma*w2; bias2-row]
        ],
        out_specs=full((bs, 1)),
    )(inputs, w1 := params["w1"], packed)


def init_params(key, window_size, num_classes):
    """Mimics torch defaults: Linear U[-1/sqrt(fan_in), 1/sqrt(fan_in)],
    BatchNorm1d gamma=1, beta=0.  fc1 weight stored transposed, fc2 weight
    stored as a (1, HIDDEN) row (== torch fc2.weight)."""
    input_size = window_size + num_classes
    k1, k2, k3, k4 = jax.random.split(key, 4)
    bound1 = 1.0 / jnp.sqrt(jnp.float32(input_size))
    bound2 = 1.0 / jnp.sqrt(jnp.float32(HIDDEN))
    return {
        "w1": jax.random.uniform(k1, (input_size, HIDDEN), jnp.float32,
                                 -bound1, bound1),
        "b1": jax.random.uniform(k2, (1, HIDDEN), jnp.float32, -bound1, bound1),
        "gamma": jnp.ones((1, HIDDEN), jnp.float32),   # BatchNorm1d weight
        "beta": jnp.zeros((1, HIDDEN), jnp.float32),   # BatchNorm1d bias
        "w2": jax.random.uniform(k3, (1, HIDDEN), jnp.float32, -bound2, bound2),
        "b2": jax.random.uniform(k4, (1,), jnp.float32, -bound2, bound2),
    }


if __name__ == "__main__":
    window_size = 16
    num_classes = 3
    batch = 8

    key = jax.random.PRNGKey(0)
    kp, kx, kc = jax.random.split(key, 3)

    params = init_params(kp, window_size, num_classes)

    x = jax.random.normal(kx, (batch, window_size), jnp.float32)
    labels = jax.random.randint(kc, (batch,), 0, num_classes)
    c = jax.nn.one_hot(labels, num_classes, dtype=jnp.float32)

    fwd = jax.jit(discriminator_forward)
    out = jax.block_until_ready(fwd(x, c, params))

    # Pure-JAX reference (same math, un-fused).
    inputs = jnp.concatenate([x, c], axis=1)
    h = jnp.maximum(inputs @ params["w1"] + params["b1"], 0.0)
    mean = jnp.mean(h, axis=0, keepdims=True)
    var = jnp.mean((h - mean) ** 2, axis=0, keepdims=True)
    hn = (h - mean) * jax.lax.rsqrt(var + BN_EPS) * params["gamma"] + params["beta"]
    ref = jax.nn.sigmoid(jnp.sum(hn * params["w2"], axis=-1, keepdims=True)
                         + params["b2"][0])

    assert out.shape == (batch, 1)
    assert bool(jnp.all((out >= 0.0) & (out <= 1.0)))
    assert bool(jnp.allclose(out, ref, atol=1e-5, rtol=1e-5))
    print("KERNEL_OK")
</pallas_src>

<mosaic_0001>
module attributes {stable_mosaic.version = 11 : i64} {
  func.func @_discriminator_kernel(%arg0: memref<8x19xf32, #tpu.memory_space<vmem>>, %arg1: memref<19x200xf32, #tpu.memory_space<vmem>>, %arg2: memref<3x200xf32, #tpu.memory_space<vmem>>, %arg3: memref<8x1xf32, #tpu.memory_space<vmem>>) attributes {dimension_semantics = [], scalar_prefetch = 0 : i64, scratch_operands = 0 : i64, tpu.core_type = #tpu.core_type<tc>} {
    %c0 = arith.constant 0 : index
    %c0_0 = arith.constant 0 : index
    %0 = vector.load %arg2[%c0, %c0_0] : memref<3x200xf32, #tpu.memory_space<vmem>>, vector<1x200xf32>
    %c1 = arith.constant 1 : index
    %c0_1 = arith.constant 0 : index
    %1 = vector.load %arg2[%c1, %c0_1] : memref<3x200xf32, #tpu.memory_space<vmem>>, vector<1x200xf32>
    %c2 = arith.constant 2 : index
    %c0_2 = arith.constant 0 : index
    %2 = vector.load %arg2[%c2, %c0_2] : memref<3x200xf32, #tpu.memory_space<vmem>>, vector<1x1xf32>
    %c0_3 = arith.constant 0 : index
    %c0_4 = arith.constant 0 : index
    %3 = vector.load %arg0[%c0_3, %c0_4] : memref<8x19xf32, #tpu.memory_space<vmem>>, vector<8x19xf32>
    %c0_5 = arith.constant 0 : index
    %c0_6 = arith.constant 0 : index
    %4 = vector.load %arg1[%c0_5, %c0_6] : memref<19x200xf32, #tpu.memory_space<vmem>>, vector<19x200xf32>
    %cst = arith.constant dense<0.000000e+00> : vector<8x200xf32>
    %5 = tpu.matmul %3, %4, %cst {dimension_numbers = #tpu.dot_dimension_numbers<[1], [0], [0], [1], [0, 0, 1, 1], [], []>} : vector<8x19xf32>, vector<19x200xf32>, vector<8x200xf32> -> vector<8x200xf32>
    %6 = vector.broadcast %0 : vector<1x200xf32> to vector<8x200xf32>
    %7 = arith.addf %5, %6 : vector<8x200xf32>
    %cst_7 = arith.constant 0.000000e+00 : f32
    %8 = vector.broadcast %cst_7 : f32 to vector<8x200xf32>
    %9 = arith.maximumf %7, %8 : vector<8x200xf32>
    %cst_8 = arith.constant dense<0.000000e+00> : vector<200xf32>
    %10 = vector.multi_reduction <add>, %9, %cst_8 [0] : vector<8x200xf32> to vector<200xf32>
    %11 = vector.shape_cast %10 : vector<200xf32> to vector<1x200xf32>
    %cst_9 = arith.constant 8.000000e+00 : f32
    %12 = vector.broadcast %cst_9 : f32 to vector<1x200xf32>
    %13 = arith.divf %11, %12 : vector<1x200xf32>
    %14 = vector.broadcast %13 : vector<1x200xf32> to vector<8x200xf32>
    %15 = arith.subf %9, %14 : vector<8x200xf32>
    %16 = arith.mulf %15, %15 : vector<8x200xf32>
    %cst_10 = arith.constant dense<0.000000e+00> : vector<200xf32>
    %17 = vector.multi_reduction <add>, %16, %cst_10 [0] : vector<8x200xf32> to vector<200xf32>
    %18 = vector.shape_cast %17 : vector<200xf32> to vector<1x200xf32>
    %cst_11 = arith.constant 8.000000e+00 : f32
    %19 = vector.broadcast %cst_11 : f32 to vector<1x200xf32>
    %20 = arith.divf %18, %19 : vector<1x200xf32>
    %cst_12 = arith.constant 9.99999974E-6 : f32
    %21 = vector.broadcast %cst_12 : f32 to vector<1x200xf32>
    %22 = arith.addf %20, %21 : vector<1x200xf32>
    %23 = math.rsqrt %22 : vector<1x200xf32>
    %24 = arith.mulf %1, %23 : vector<1x200xf32>
    %25 = vector.broadcast %24 : vector<1x200xf32> to vector<8x200xf32>
    %26 = arith.mulf %15, %25 : vector<8x200xf32>
    %cst_13 = arith.constant dense<0.000000e+00> : vector<8xf32>
    %27 = vector.multi_reduction <add>, %26, %cst_13 [1] : vector<8x200xf32> to vector<8xf32>
    %28 = vector.shape_cast %27 : vector<8xf32> to vector<8x1xf32>
    %29 = vector.broadcast %2 : vector<1x1xf32> to vector<8x1xf32>
    %30 = arith.addf %28, %29 : vector<8x1xf32>
    %31 = math.absf %30 : vector<8x1xf32>
    %cst_14 = arith.constant 0.000000e+00 : f32
    %32 = vector.broadcast %cst_14 : f32 to vector<8x1xf32>
    %33 = arith.subf %32, %31 : vector<8x1xf32>
    %34 = math.exp %33 : vector<8x1xf32>
    %cst_15 = arith.constant 0.000000e+00 : f32
    %35 = vector.broadcast %cst_15 : f32 to vector<8x1xf32>
    %36 = arith.cmpf oge, %30, %35 : vector<8x1xf32>
    %cst_16 = arith.constant 1.000000e+00 : f32
    %37 = vector.broadcast %cst_16 : f32 to vector<8x1xf32>
    %38 = arith.addf %37, %34 : vector<8x1xf32>
    %cst_17 = arith.constant 1.000000e+00 : f32
    %39 = vector.broadcast %cst_17 : f32 to vector<8x1xf32>
    %40 = arith.divf %39, %38 : vector<8x1xf32>
    %cst_18 = arith.constant 1.000000e+00 : f32
    %41 = vector.broadcast %cst_18 : f32 to vector<8x1xf32>
    %42 = arith.addf %41, %34 : vector<8x1xf32>
    %43 = arith.divf %34, %42 : vector<8x1xf32>
    %44 = arith.select %36, %40, %43 : vector<8x1xi1>, vector<8x1xf32>
    %c0_19 = arith.constant 0 : index
    %c0_20 = arith.constant 0 : index
    %45 = vector.load %arg3[%c0_19, %c0_20] : memref<8x1xf32, #tpu.memory_space<vmem>>, vector<8x1xf32>
    tpu.vector_store %arg3[%c0_19, %c0_20], %44 {strides = array<i32>} : memref<8x1xf32, #tpu.memory_space<vmem>>, vector<8x1xf32>,
    return
  }
}

</mosaic_0001>

<bundles_post_ra>
// kernel: discriminator_forward.1
= control target key start
LH: loop header
LB: loop body
LE: loop exit
PB: predicated region body
PF: predicated region fallthrough
CT: control target
= control target key end

     0   :  { %v236_v3 = vmov 0.0   ;;  %vm40_vm0 = vcmask 1042432   ;;  %vm36_vm1 = vcmask 154624   ;;  %v26_v10 = vlaneseq  ;;  %s299_s1 = inlined_call_operand.vmem [shape: f32[19,200], index: 1, kind: input, shape index: {}]   ;;  %s300_s0 = inlined_call_operand.vmem [shape: f32[8,19], index: 0, kind: input, shape index: {}]   ;;  %s301_s2 = inlined_call_operand.vmem [shape: f32[3,200], index: 2, kind: input, shape index: {}]   ;;  %s302_s3 = inlined_call_operand.vmem [shape: f32[8,1], index: 3, kind: output, shape index: {}]  }
   0x1   :  { %v20_v0 = vld [vmem:[%s299_s1 + $0x8] sm:$0xff]  ;;  %v22_v1 = vld [vmem:[%s299_s1 + $0x18] sm:$0xff]  ;;  %v19_v2 = vld [vmem:[%s299_s1] sm:$0xff]  ;;  %111 = vmatprep.mubr.f32.mxu0 %v236_v3  ;;  %vm126_vm2 = vcmask 588800   ;;  %v237_v59 = vmov 1966171168  }
   0x2   :  { %v222_v4 = vpack.c.bf16 %v22_v1, %v20_v0  ;;  %v21_v5 = vld [vmem:[%s299_s1 + $0x10] sm:$0xff]  ;;  %v24_v7 = vld [vmem:[%s299_s1 + $0x28] sm:$0x7]  ;;  %v23_v8 = vld [vmem:[%s299_s1 + $0x20] sm:$0x7]  ;;  %v279_v11 = vshrl.u32 %v26_v10, 7  ;;  %v164_v60 = vunpack.c.l.s4 %v237_v59 }
   0x3   :  { %v224_v6 = vpack.c.bf16 %v21_v5, %v19_v2  ;;  %v18_v9 = vld [vmem:[%s300_s0] sm:$0xff]  ;;  %vm211_vm3 = vcmask 7168  }
   0x4   :  { %223 = vmatprep.subr.bf16.mxu0 %v222_v4  ;;  %v28_v12 = vsub.s32 0, %v279_v11  ;;  %v14_v13 = vld [vmem:[%s301_s2] ss:$4 sm:$0x3]  ;;  %v32_v14 = vsub.s32 1, %v279_v11  ;;  %v165_v61 = vunpack.c.0.s8 %v164_v60 }
   0x5   :  { %225 = vmatpush1.bf16.msra.mxu0 %v224_v6  ;;  %v217_v3 = vld [vmem:[%s301_s2 + $0x1] ss:$4 sm:$0x3] }
   0x6   :  { %218 = vmatprep.subr.msk.mxu0 %vm40_vm0, %v24_v7  ;;  %v29_v15 = vrot.slane %v14_v13, %v28_v12  ;;  %v33_v16 = vrot.slane %v14_v13, %v32_v14  ;;  %v168_v63 = vsub.s32 %v165_v61, %v279_v11  ;;  %v221_v11 = vld [vmem:[%s301_s2 + $0x2] ss:$0 sm:$0xff] }
   0x9   :  { %219 = vmatpush1.msk.msra.mxu0 %vm40_vm0, %v23_v8 }
   0xa   :  { %220 = vmatmul.mubr.msk.f32.vlgmr.msra.gmra.mrb[0].mxu0 %vm36_vm1, %v18_v9 }
  0xdd   :  { %v113_v17 = vpop.f32.mrb[0].mxu0 }
  0xde   :  { %v114_v18 = vadd.f32 %v113_v17, %v29_v15  ;;  %v115_v19 = vpop.f32.mrb[1].mxu0 }
  0xdf   :  { %v116_v20 = vadd.f32 %v115_v19, %v33_v16 }
  0xe0   :  { %v118_v21 = vmax.f32 %v114_v18, 0.0 }
  0xe1   :  { %v119_v22 = vmax.f32 %v116_v20, 0.0 }
  0xe2   :  { %v120_v23 = vrot.slane %v118_v21, 4 }
  0xe3   :  { %v127_v24 = vsel %vm126_vm2, %v119_v22, 0.0 }
  0xe4   :  { %v121_v25 = vadd.f32 %v120_v23, %v118_v21  ;;  %v128_v26 = vrot.slane %v127_v24, 4 }
  0xe6   :  { %v122_v27 = vrot.slane %v121_v25, 2  ;;  %v129_v28 = vadd.f32 %v128_v26, %v127_v24 }
  0xe8   :  { %v123_v29 = vadd.f32 %v122_v27, %v121_v25  ;;  %v130_v30 = vrot.slane %v129_v28, 2 }
  0xea   :  { %v131_v31 = vadd.f32 %v130_v30, %v129_v28  ;;  %v124_v32 = vrot.slane %v123_v29, 1 }
  0xec   :  { %v132_v33 = vrot.slane %v131_v31, 1  ;;  %v125_v34 = vadd.f32 %v124_v32, %v123_v29 }
  0xee   :  { %v133_v35 = vadd.f32 %v132_v33, %v131_v31  ;;  %v135_v36 = vmul.f32 0.125, %v125_v34 }
  0xf0   :  { %v136_v37 = vmul.f32 0.125, %v133_v35  ;;  %v137_v38 = vsub.f32 %v118_v21, %v135_v36 }
  0xf2   :  { %v138_v39 = vsub.f32 %v119_v22, %v136_v37  ;;  %v139_v40 = vmul.f32 %v137_v38, %v137_v38 }
  0xf4   :  { %v140_v41 = vmul.f32 %v138_v39, %v138_v39  ;;  %v141_v42 = vrot.slane %v139_v40, 4 }
  0xf6   :  { %v147_v43 = vsel %vm126_vm2, %v140_v41, 0.0  ;;  %v142_v44 = vadd.f32 %v141_v42, %v139_v40 }
  0xf7   :  { %v148_v45 = vrot.slane %v147_v43, 4 }
  0xf8   :  { %v143_v46 = vrot.slane %v142_v44, 2 }
  0xf9   :  { %v149_v47 = vadd.f32 %v148_v45, %v147_v43 }
  0xfa   :  { %v144_v48 = vadd.f32 %v143_v46, %v142_v44 }
  0xfb   :  { %v150_v49 = vrot.slane %v149_v47, 2 }
  0xfc   :  { %v145_v50 = vrot.slane %v144_v48, 1 }
  0xfd   :  { %v151_v51 = vadd.f32 %v150_v49, %v149_v47 }
  0xfe   :  { %v146_v52 = vadd.f32 %v145_v50, %v144_v48 }
  0xff   :  { %v152_v53 = vrot.slane %v151_v51, 1 }
 0x100   :  { %v154_v54 = vmul.f32 0.125, %v146_v52 }
 0x101   :  { %v153_v55 = vadd.f32 %v152_v53, %v151_v51 }
 0x102   :  { %v156_v56 = vadd.f32 1e-05, %v154_v54 }
 0x103   :  { %v155_v57 = vmul.f32 0.125, %v153_v55 }
 0x104   :  { %228 = vrsqrt.f32 %v156_v56 }
 0x105   :  { %v157_v58 = vadd.f32 1e-05, %v155_v57 }
 0x107   :  { %230 = vrsqrt.f32 %v157_v58 }
 0x10e   :  { %v229_v62 = vpop.eup %228 }
 0x111   :  { %v231_v0 = vpop.eup %230 }
 0x112   :  { %v162_v1 = vcombine.low %v229_v62, %v231_v0 }
 0x114   :  { %v169_v2 = vrot.slane %v162_v1, %v168_v63 }
 0x116   :  { %v176_v4 = vrot.slane %v169_v2, %v168_v63 }
 0x118   :  { %v178_v5 = vmul.f32 %v217_v3, %v176_v4 }
 0x11a   :  { %v183_v6 = vrot.slane %v178_v5, %v28_v12  ;;  %v187_v7 = vrot.slane %v178_v5, %v32_v14 }
 0x11c   :  { %v190_v8 = vmul.f32 %v183_v6, %v137_v38  ;;  %v191_v9 = vmul.f32 %v187_v7, %v138_v39 }
 0x11e   :  { %v192_v10 = vsel %vm126_vm2, %v191_v9, 0.0 }
 0x11f   :  { %v193_v13 = vadd.f32 %v192_v10, %v190_v8 }
 0x121   :  { %194 = vadd.xlane.f32.xlu0 %v193_v13 }
 0x1ae   :  { %v195_v15 = vpop.xlane.xlu0 %194 }
 0x1af   :  { %v200_v16 = vadd.f32 %v221_v11, %v195_v15 }
 0x1b1   :  { %v201_v17 = vand.u32 2147483647, %v200_v16  ;;  %vm205_vm4 = vcmp.ge.f32.partialorder %v200_v16, 0.0 }
 0x1b3   :  { %v202_v18 = vsub.f32 0.0, %v201_v17 }
 0x1b5   :  { %v203_v19 = vmul.f32 1.442695, %v202_v18 }
 0x1b7   :  { %232 = vpow2.f32 %v203_v19 }
 0x1c1   :  { %v233_v20 = vpop.eup %232 }
 0x1c2   :  { %v206_v21 = vadd.f32 1.0, %v233_v20 }
 0x1c4   :  { %234 = vrcp.f32 %v206_v21 }
 0x1ce   :  { %v235_v12 = vpop.eup %234 }
 0x1cf   :  { %v209_v14 = vmul.f32 %v235_v12, %v233_v20 }
 0x1d1   :  { %v210_v22 = vsel %vm205_vm4, %v235_v12, %v209_v14 }
 0x1d2   :  { %212 = vst.msk [vmem:[%s302_s3] sm:$0xff] %vm211_vm3, %v210_v22 }

</bundles_post_ra>
